<compile_context>
chip_gen: v7x
topology: tpu7x:2x2x1
jax: 0.10.0
libtpu: 0.0.40
codegen_flags: <defaults>
</compile_context>

<pallas_src>
import jax
import jax.numpy as jnp
from jax.experimental import pallas as pl
from jax.experimental.pallas import tpu as pltpu


_MAX_TT = 128           # max timesteps per grid step (static unroll length)
_MAX_BHT = 8 * 512      # max B*H elements per lane tile (4 f32 vregs / operand / step)
_LANE_BLOCK = 8 * 128   # B*H elements that fill exactly one f32 vreg per timestep


def _round_up(v, m):
    return (v + m - 1) // m * m


def _make_forgetmult_kernel(tt, has_h0):
    """Build a kernel for a (tt, 8, wt) time block; carry held in registers."""

    def kernel(*refs):
        if has_h0:
            f_ref, x_ref, h0_ref, o_ref, carry_ref = refs
        else:
            f_ref, x_ref, o_ref, carry_ref = refs
            h0_ref = None

        tb = pl.program_id(1)  # time-block index (sequential axis)

        @pl.when(tb == 0)
        def _init():
            if has_h0:
                carry_ref[...] = h0_ref[...].astype(jnp.float32)
            else:
                carry_ref[...] = jnp.zeros_like(carry_ref)

        # Read the carried state ONCE per block; keep it in registers.
        h = carry_ref[...]                         # (8, wt) f32
        for t in range(tt):                        # static unroll over the block
            ft = f_ref[t].astype(jnp.float32)      # (8, wt) — full, dense vregs
            xt = x_ref[t].astype(jnp.float32)
            h = ft * xt + (1.0 - ft) * h
            o_ref[t] = h.astype(o_ref.dtype)
        # Write the carry ONCE per block.
        carry_ref[...] = h

    return kernel


def forget_mult(f, x, hidden_init=None):
    """f, x: (T, B, H); hidden_init: (B, H) or None. Returns (T, B, H)."""
    T, B, H = f.shape
    assert x.shape == (T, B, H)
    out_dtype = x.dtype
    BH = B * H

    # ---- tile-size selection -------------------------------------------------
    n_bh = max(1, pl.cdiv(BH, _MAX_BHT))                 # lane-tile count (parallel)
    bht = _round_up(pl.cdiv(BH, n_bh), _LANE_BLOCK)      # B*H elements per tile
    bh_pad = n_bh * bht
    wt = bht // 8                                        # lane width per tile (mult of 128)
    w = bh_pad // 8

    n_tb = max(1, pl.cdiv(T, _MAX_TT))                   # time blocks (sequential)
    tt = pl.cdiv(T, n_tb)                                # timesteps per block
    t_pad = n_tb * tt

    # ---- layout: (T, B, H) -> (T_pad, 8, W); pads are zeros ------------------
    f2 = f.reshape(T, BH)
    x2 = x.reshape(T, BH)
    if bh_pad != BH:
        f2 = jnp.pad(f2, ((0, 0), (0, bh_pad - BH)))
        x2 = jnp.pad(x2, ((0, 0), (0, bh_pad - BH)))
    if t_pad != T:
        # padded f == 0 => h just carries through padded steps; rows are discarded.
        f2 = jnp.pad(f2, ((0, t_pad - T), (0, 0)))
        x2 = jnp.pad(x2, ((0, t_pad - T), (0, 0)))
    f3 = f2.reshape(t_pad, 8, w)
    x3 = x2.reshape(t_pad, 8, w)

    has_h0 = hidden_init is not None
    inputs = [f3, x3]
    in_specs = [
        pl.BlockSpec((tt, 8, wt), lambda j, tb: (tb, 0, j)),   # f block
        pl.BlockSpec((tt, 8, wt), lambda j, tb: (tb, 0, j)),   # x block
    ]
    if has_h0:
        h02 = hidden_init.reshape(1, BH)
        if bh_pad != BH:
            h02 = jnp.pad(h02, ((0, 0), (0, bh_pad - BH)))
        inputs.append(h02.reshape(8, w))
        in_specs.append(pl.BlockSpec((8, wt), lambda j, tb: (0, j)))

    out3 = pl.pallas_call(
        _make_forgetmult_kernel(tt, has_h0),
        out_shape=jax.ShapeDtypeStruct((t_pad, 8, w), out_dtype),
        grid_spec=pltpu.PrefetchScalarGridSpec(
            num_scalar_prefetch=0,
            grid=(n_bh, n_tb),
            in_specs=in_specs,
            out_specs=pl.BlockSpec((tt, 8, wt), lambda j, tb: (tb, 0, j)),
            scratch_shapes=[pltpu.VMEM((8, wt), jnp.float32)],   # carried h (per core)
        ),
        compiler_params=pltpu.CompilerParams(
            dimension_semantics=("parallel", "arbitrary"),  # BH tiles parallel, time sequential
            vmem_limit_bytes=32 * 1024 * 1024,              # ~12 MB used at max tiles; headroom
        ),
    )(*inputs)

    return out3.reshape(t_pad, bh_pad)[:T, :BH].reshape(T, B, H)


def _forget_mult_ref(f, x, hidden_init=None):
    """Pure-JAX reference (mirrors the PyTorch loop)."""
    T, B, H = f.shape
    h0 = jnp.zeros((B, H), f.dtype) if hidden_init is None else hidden_init.astype(jnp.float32)

    def step(h_prev, ft_xt):
        ft, xt = ft_xt
        h = ft * xt + (1.0 - ft) * h_prev
        return h, h

    _, hs = jax.lax.scan(step, h0.astype(jnp.float32),
                         (f.astype(jnp.float32), x.astype(jnp.float32)))
    return hs


if __name__ == "__main__":
    key = jax.random.PRNGKey(0)
    kf, kx, kh = jax.random.split(key, 3)

    # Case 1: small canonical shapes, with hidden_init.
    T, B, H = 8, 4, 128
    f = jax.nn.sigmoid(jax.random.normal(kf, (T, B, H), dtype=jnp.float32))
    x = jax.random.normal(kx, (T, B, H), dtype=jnp.float32)
    h0 = jax.random.normal(kh, (B, H), dtype=jnp.float32)

    out = jax.block_until_ready(forget_mult(f, x, h0))
    ref = _forget_mult_ref(f, x, h0)
    assert out.shape == (T, B, H)
    assert jnp.allclose(out, ref, atol=1e-5, rtol=1e-5), "mismatch (with hidden_init)"

    # Case 2: hidden_init=None path (specialised kernel, zero-init carry).
    out_none = jax.block_until_ready(forget_mult(f, x, None))
    ref_none = _forget_mult_ref(f, x, None)
    assert jnp.allclose(out_none, ref_none, atol=1e-5, rtol=1e-5), "mismatch (no hidden_init)"

    # Case 3: odd shapes exercising lane padding, multiple BH tiles and
    # multiple time blocks (carry handed across grid steps).
    T2, B2, H2 = 130, 8, 520
    k1, k2, k3 = jax.random.split(jax.random.PRNGKey(0), 3)
    f2 = jax.nn.sigmoid(jax.random.normal(k1, (T2, B2, H2), dtype=jnp.float32))
    x2 = jax.random.normal(k2, (T2, B2, H2), dtype=jnp.float32)
    h02 = jax.random.normal(k3, (B2, H2), dtype=jnp.float32)

    out2 = jax.block_until_ready(forget_mult(f2, x2, h02))
    ref2 = _forget_mult_ref(f2, x2, h02)
    assert out2.shape == (T2, B2, H2)
    assert jnp.allclose(out2, ref2, atol=1e-4, rtol=1e-4), "mismatch (padded / multi-block)"

    print("KERNEL_OK")
</pallas_src>

<mosaic_0001>
module attributes {stable_mosaic.version = 11 : i64} {
  func.func @kernel(%arg0: i32, %arg1: i32, %arg2: memref<8x8x128xf32, #tpu.memory_space<vmem>>, %arg3: memref<8x8x128xf32, #tpu.memory_space<vmem>>, %arg4: memref<8x128xf32, #tpu.memory_space<vmem>>, %arg5: memref<8x8x128xf32, #tpu.memory_space<vmem>>, %arg6: memref<8x128xf32, #tpu.memory_space<vmem>>) attributes {dimension_semantics = [#tpu.dimension_semantics<parallel>, #tpu.dimension_semantics<arbitrary>], iteration_bounds = array<i64: 1, 1>, scalar_prefetch = 0 : i64, scratch_operands = 1 : i64, tpu.core_type = #tpu.core_type<tc>, window_params = [{transform_indices = @transform_0, window_bounds = array<i64: 8, 8, 128>}, {transform_indices = @transform_1, window_bounds = array<i64: 8, 8, 128>}, {transform_indices = @transform_2, window_bounds = array<i64: 8, 128>}, {transform_indices = @transform_3, window_bounds = array<i64: 8, 8, 128>}]} {
    %c0_i32 = arith.constant 0 : i32
    %0 = arith.cmpi eq, %arg1, %c0_i32 : i32
    %1 = arith.extui %0 : i1 to i32
    %c0_i32_0 = arith.constant 0 : i32
    %2 = arith.cmpi ne, %1, %c0_i32_0 : i32
    scf.if %2 {
      %c0_76 = arith.constant 0 : index
      %c0_77 = arith.constant 0 : index
      %101 = vector.load %arg4[%c0_76, %c0_77] : memref<8x128xf32, #tpu.memory_space<vmem>>, vector<8x128xf32>
      %c0_78 = arith.constant 0 : index
      %c0_79 = arith.constant 0 : index
      %102 = vector.load %arg6[%c0_78, %c0_79] : memref<8x128xf32, #tpu.memory_space<vmem>>, vector<8x128xf32>
      tpu.vector_store %arg6[%c0_78, %c0_79], %101 {strides = array<i32>} : memref<8x128xf32, #tpu.memory_space<vmem>>, vector<8x128xf32>,
    } else {
    }
    %c0 = arith.constant 0 : index
    %c0_1 = arith.constant 0 : index
    %3 = vector.load %arg6[%c0, %c0_1] : memref<8x128xf32, #tpu.memory_space<vmem>>, vector<8x128xf32>
    %c0_2 = arith.constant 0 : index
    %c0_3 = arith.constant 0 : index
    %c0_4 = arith.constant 0 : index
    %4 = vector.load %arg2[%c0_2, %c0_3, %c0_4] : memref<8x8x128xf32, #tpu.memory_space<vmem>>, vector<1x8x128xf32>
    %5 = vector.shape_cast %4 : vector<1x8x128xf32> to vector<8x128xf32>
    %c0_5 = arith.constant 0 : index
    %c0_6 = arith.constant 0 : index
    %c0_7 = arith.constant 0 : index
    %6 = vector.load %arg3[%c0_5, %c0_6, %c0_7] : memref<8x8x128xf32, #tpu.memory_space<vmem>>, vector<1x8x128xf32>
    %7 = vector.shape_cast %6 : vector<1x8x128xf32> to vector<8x128xf32>
    %8 = arith.mulf %5, %7 : vector<8x128xf32>
    %cst = arith.constant 1.000000e+00 : f32
    %9 = vector.broadcast %cst : f32 to vector<8x128xf32>
    %10 = arith.subf %9, %5 : vector<8x128xf32>
    %11 = arith.mulf %10, %3 : vector<8x128xf32>
    %12 = arith.addf %8, %11 : vector<8x128xf32>
    %c0_8 = arith.constant 0 : index
    %c0_9 = arith.constant 0 : index
    %c0_10 = arith.constant 0 : index
    %13 = vector.load %arg5[%c0_8, %c0_9, %c0_10] : memref<8x8x128xf32, #tpu.memory_space<vmem>>, vector<1x8x128xf32>
    %14 = vector.shape_cast %13 : vector<1x8x128xf32> to vector<8x128xf32>
    %15 = vector.shape_cast %12 : vector<8x128xf32> to vector<1x8x128xf32>
    tpu.vector_store %arg5[%c0_8, %c0_9, %c0_10], %15 {strides = array<i32>} : memref<8x8x128xf32, #tpu.memory_space<vmem>>, vector<1x8x128xf32>,
    %c1 = arith.constant 1 : index
    %c0_11 = arith.constant 0 : index
    %c0_12 = arith.constant 0 : index
    %16 = vector.load %arg2[%c1, %c0_11, %c0_12] : memref<8x8x128xf32, #tpu.memory_space<vmem>>, vector<1x8x128xf32>
    %17 = vector.shape_cast %16 : vector<1x8x128xf32> to vector<8x128xf32>
    %c1_13 = arith.constant 1 : index
    %c0_14 = arith.constant 0 : index
    %c0_15 = arith.constant 0 : index
    %18 = vector.load %arg3[%c1_13, %c0_14, %c0_15] : memref<8x8x128xf32, #tpu.memory_space<vmem>>, vector<1x8x128xf32>
    %19 = vector.shape_cast %18 : vector<1x8x128xf32> to vector<8x128xf32>
    %20 = arith.mulf %17, %19 : vector<8x128xf32>
    %cst_16 = arith.constant 1.000000e+00 : f32
    %21 = vector.broadcast %cst_16 : f32 to vector<8x128xf32>
    %22 = arith.subf %21, %17 : vector<8x128xf32>
    %23 = arith.mulf %22, %12 : vector<8x128xf32>
    %24 = arith.addf %20, %23 : vector<8x128xf32>
    %c1_17 = arith.constant 1 : index
    %c0_18 = arith.constant 0 : index
    %c0_19 = arith.constant 0 : index
    %25 = vector.load %arg5[%c1_17, %c0_18, %c0_19] : memref<8x8x128xf32, #tpu.memory_space<vmem>>, vector<1x8x128xf32>
    %26 = vector.shape_cast %25 : vector<1x8x128xf32> to vector<8x128xf32>
    %27 = vector.shape_cast %24 : vector<8x128xf32> to vector<1x8x128xf32>
    tpu.vector_store %arg5[%c1_17, %c0_18, %c0_19], %27 {strides = array<i32>} : memref<8x8x128xf32, #tpu.memory_space<vmem>>, vector<1x8x128xf32>,
    %c2 = arith.constant 2 : index
    %c0_20 = arith.constant 0 : index
    %c0_21 = arith.constant 0 : index
    %28 = vector.load %arg2[%c2, %c0_20, %c0_21] : memref<8x8x128xf32, #tpu.memory_space<vmem>>, vector<1x8x128xf32>
    %29 = vector.shape_cast %28 : vector<1x8x128xf32> to vector<8x128xf32>
    %c2_22 = arith.constant 2 : index
    %c0_23 = arith.constant 0 : index
    %c0_24 = arith.constant 0 : index
    %30 = vector.load %arg3[%c2_22, %c0_23, %c0_24] : memref<8x8x128xf32, #tpu.memory_space<vmem>>, vector<1x8x128xf32>
    %31 = vector.shape_cast %30 : vector<1x8x128xf32> to vector<8x128xf32>
    %32 = arith.mulf %29, %31 : vector<8x128xf32>
    %cst_25 = arith.constant 1.000000e+00 : f32
    %33 = vector.broadcast %cst_25 : f32 to vector<8x128xf32>
    %34 = arith.subf %33, %29 : vector<8x128xf32>
    %35 = arith.mulf %34, %24 : vector<8x128xf32>
    %36 = arith.addf %32, %35 : vector<8x128xf32>
    %c2_26 = arith.constant 2 : index
    %c0_27 = arith.constant 0 : index
    %c0_28 = arith.constant 0 : index
    %37 = vector.load %arg5[%c2_26, %c0_27, %c0_28] : memref<8x8x128xf32, #tpu.memory_space<vmem>>, vector<1x8x128xf32>
    %38 = vector.shape_cast %37 : vector<1x8x128xf32> to vector<8x128xf32>
    %39 = vector.shape_cast %36 : vector<8x128xf32> to vector<1x8x128xf32>
    tpu.vector_store %arg5[%c2_26, %c0_27, %c0_28], %39 {strides = array<i32>} : memref<8x8x128xf32, #tpu.memory_space<vmem>>, vector<1x8x128xf32>,
    %c3 = arith.constant 3 : index
    %c0_29 = arith.constant 0 : index
    %c0_30 = arith.constant 0 : index
    %40 = vector.load %arg2[%c3, %c0_29, %c0_30] : memref<8x8x128xf32, #tpu.memory_space<vmem>>, vector<1x8x128xf32>
    %41 = vector.shape_cast %40 : vector<1x8x128xf32> to vector<8x128xf32>
    %c3_31 = arith.constant 3 : index
    %c0_32 = arith.constant 0 : index
    %c0_33 = arith.constant 0 : index
    %42 = vector.load %arg3[%c3_31, %c0_32, %c0_33] : memref<8x8x128xf32, #tpu.memory_space<vmem>>, vector<1x8x128xf32>
    %43 = vector.shape_cast %42 : vector<1x8x128xf32> to vector<8x128xf32>
    %44 = arith.mulf %41, %43 : vector<8x128xf32>
    %cst_34 = arith.constant 1.000000e+00 : f32
    %45 = vector.broadcast %cst_34 : f32 to vector<8x128xf32>
    %46 = arith.subf %45, %41 : vector<8x128xf32>
    %47 = arith.mulf %46, %36 : vector<8x128xf32>
    %48 = arith.addf %44, %47 : vector<8x128xf32>
    %c3_35 = arith.constant 3 : index
    %c0_36 = arith.constant 0 : index
    %c0_37 = arith.constant 0 : index
    %49 = vector.load %arg5[%c3_35, %c0_36, %c0_37] : memref<8x8x128xf32, #tpu.memory_space<vmem>>, vector<1x8x128xf32>
    %50 = vector.shape_cast %49 : vector<1x8x128xf32> to vector<8x128xf32>
    %51 = vector.shape_cast %48 : vector<8x128xf32> to vector<1x8x128xf32>
    tpu.vector_store %arg5[%c3_35, %c0_36, %c0_37], %51 {strides = array<i32>} : memref<8x8x128xf32, #tpu.memory_space<vmem>>, vector<1x8x128xf32>,
    %c4 = arith.constant 4 : index
    %c0_38 = arith.constant 0 : index
    %c0_39 = arith.constant 0 : index
    %52 = vector.load %arg2[%c4, %c0_38, %c0_39] : memref<8x8x128xf32, #tpu.memory_space<vmem>>, vector<1x8x128xf32>
    %53 = vector.shape_cast %52 : vector<1x8x128xf32> to vector<8x128xf32>
    %c4_40 = arith.constant 4 : index
    %c0_41 = arith.constant 0 : index
    %c0_42 = arith.constant 0 : index
    %54 = vector.load %arg3[%c4_40, %c0_41, %c0_42] : memref<8x8x128xf32, #tpu.memory_space<vmem>>, vector<1x8x128xf32>
    %55 = vector.shape_cast %54 : vector<1x8x128xf32> to vector<8x128xf32>
    %56 = arith.mulf %53, %55 : vector<8x128xf32>
    %cst_43 = arith.constant 1.000000e+00 : f32
    %57 = vector.broadcast %cst_43 : f32 to vector<8x128xf32>
    %58 = arith.subf %57, %53 : vector<8x128xf32>
    %59 = arith.mulf %58, %48 : vector<8x128xf32>
    %60 = arith.addf %56, %59 : vector<8x128xf32>
    %c4_44 = arith.constant 4 : index
    %c0_45 = arith.constant 0 : index
    %c0_46 = arith.constant 0 : index
    %61 = vector.load %arg5[%c4_44, %c0_45, %c0_46] : memref<8x8x128xf32, #tpu.memory_space<vmem>>, vector<1x8x128xf32>
    %62 = vector.shape_cast %61 : vector<1x8x128xf32> to vector<8x128xf32>
    %63 = vector.shape_cast %60 : vector<8x128xf32> to vector<1x8x128xf32>
    tpu.vector_store %arg5[%c4_44, %c0_45, %c0_46], %63 {strides = array<i32>} : memref<8x8x128xf32, #tpu.memory_space<vmem>>, vector<1x8x128xf32>,
    %c5 = arith.constant 5 : index
    %c0_47 = arith.constant 0 : index
    %c0_48 = arith.constant 0 : index
    %64 = vector.load %arg2[%c5, %c0_47, %c0_48] : memref<8x8x128xf32, #tpu.memory_space<vmem>>, vector<1x8x128xf32>
    %65 = vector.shape_cast %64 : vector<1x8x128xf32> to vector<8x128xf32>
    %c5_49 = arith.constant 5 : index
    %c0_50 = arith.constant 0 : index
    %c0_51 = arith.constant 0 : index
    %66 = vector.load %arg3[%c5_49, %c0_50, %c0_51] : memref<8x8x128xf32, #tpu.memory_space<vmem>>, vector<1x8x128xf32>
    %67 = vector.shape_cast %66 : vector<1x8x128xf32> to vector<8x128xf32>
    %68 = arith.mulf %65, %67 : vector<8x128xf32>
    %cst_52 = arith.constant 1.000000e+00 : f32
    %69 = vector.broadcast %cst_52 : f32 to vector<8x128xf32>
    %70 = arith.subf %69, %65 : vector<8x128xf32>
    %71 = arith.mulf %70, %60 : vector<8x128xf32>
    %72 = arith.addf %68, %71 : vector<8x128xf32>
    %c5_53 = arith.constant 5 : index
    %c0_54 = arith.constant 0 : index
    %c0_55 = arith.constant 0 : index
    %73 = vector.load %arg5[%c5_53, %c0_54, %c0_55] : memref<8x8x128xf32, #tpu.memory_space<vmem>>, vector<1x8x128xf32>
    %74 = vector.shape_cast %73 : vector<1x8x128xf32> to vector<8x128xf32>
    %75 = vector.shape_cast %72 : vector<8x128xf32> to vector<1x8x128xf32>
    tpu.vector_store %arg5[%c5_53, %c0_54, %c0_55], %75 {strides = array<i32>} : memref<8x8x128xf32, #tpu.memory_space<vmem>>, vector<1x8x128xf32>,
    %c6 = arith.constant 6 : index
    %c0_56 = arith.constant 0 : index
    %c0_57 = arith.constant 0 : index
    %76 = vector.load %arg2[%c6, %c0_56, %c0_57] : memref<8x8x128xf32, #tpu.memory_space<vmem>>, vector<1x8x128xf32>
    %77 = vector.shape_cast %76 : vector<1x8x128xf32> to vector<8x128xf32>
    %c6_58 = arith.constant 6 : index
    %c0_59 = arith.constant 0 : index
    %c0_60 = arith.constant 0 : index
    %78 = vector.load %arg3[%c6_58, %c0_59, %c0_60] : memref<8x8x128xf32, #tpu.memory_space<vmem>>, vector<1x8x128xf32>
    %79 = vector.shape_cast %78 : vector<1x8x128xf32> to vector<8x128xf32>
    %80 = arith.mulf %77, %79 : vector<8x128xf32>
    %cst_61 = arith.constant 1.000000e+00 : f32
    %81 = vector.broadcast %cst_61 : f32 to vector<8x128xf32>
    %82 = arith.subf %81, %77 : vector<8x128xf32>
    %83 = arith.mulf %82, %72 : vector<8x128xf32>
    %84 = arith.addf %80, %83 : vector<8x128xf32>
    %c6_62 = arith.constant 6 : index
    %c0_63 = arith.constant 0 : index
    %c0_64 = arith.constant 0 : index
    %85 = vector.load %arg5[%c6_62, %c0_63, %c0_64] : memref<8x8x128xf32, #tpu.memory_space<vmem>>, vector<1x8x128xf32>
    %86 = vector.shape_cast %85 : vector<1x8x128xf32> to vector<8x128xf32>
    %87 = vector.shape_cast %84 : vector<8x128xf32> to vector<1x8x128xf32>
    tpu.vector_store %arg5[%c6_62, %c0_63, %c0_64], %87 {strides = array<i32>} : memref<8x8x128xf32, #tpu.memory_space<vmem>>, vector<1x8x128xf32>,
    %c7 = arith.constant 7 : index
    %c0_65 = arith.constant 0 : index
    %c0_66 = arith.constant 0 : index
    %88 = vector.load %arg2[%c7, %c0_65, %c0_66] : memref<8x8x128xf32, #tpu.memory_space<vmem>>, vector<1x8x128xf32>
    %89 = vector.shape_cast %88 : vector<1x8x128xf32> to vector<8x128xf32>
    %c7_67 = arith.constant 7 : index
    %c0_68 = arith.constant 0 : index
    %c0_69 = arith.constant 0 : index
    %90 = vector.load %arg3[%c7_67, %c0_68, %c0_69] : memref<8x8x128xf32, #tpu.memory_space<vmem>>, vector<1x8x128xf32>
    %91 = vector.shape_cast %90 : vector<1x8x128xf32> to vector<8x128xf32>
    %92 = arith.mulf %89, %91 : vector<8x128xf32>
    %cst_70 = arith.constant 1.000000e+00 : f32
    %93 = vector.broadcast %cst_70 : f32 to vector<8x128xf32>
    %94 = arith.subf %93, %89 : vector<8x128xf32>
    %95 = arith.mulf %94, %84 : vector<8x128xf32>
    %96 = arith.addf %92, %95 : vector<8x128xf32>
    %c7_71 = arith.constant 7 : index
    %c0_72 = arith.constant 0 : index
    %c0_73 = arith.constant 0 : index
    %97 = vector.load %arg5[%c7_71, %c0_72, %c0_73] : memref<8x8x128xf32, #tpu.memory_space<vmem>>, vector<1x8x128xf32>
    %98 = vector.shape_cast %97 : vector<1x8x128xf32> to vector<8x128xf32>
    %99 = vector.shape_cast %96 : vector<8x128xf32> to vector<1x8x128xf32>
    tpu.vector_store %arg5[%c7_71, %c0_72, %c0_73], %99 {strides = array<i32>} : memref<8x8x128xf32, #tpu.memory_space<vmem>>, vector<1x8x128xf32>,
    %c0_74 = arith.constant 0 : index
    %c0_75 = arith.constant 0 : index
    %100 = vector.load %arg6[%c0_74, %c0_75] : memref<8x128xf32, #tpu.memory_space<vmem>>, vector<8x128xf32>
    tpu.vector_store %arg6[%c0_74, %c0_75], %96 {strides = array<i32>} : memref<8x128xf32, #tpu.memory_space<vmem>>, vector<8x128xf32>,
    return
  }
  func.func @transform_0(%arg0: i32, %arg1: i32) -> (i32, i32, i32) {
    %c0_i32 = arith.constant 0 : i32
    %c0_i32_0 = arith.constant 0 : i32
    return %arg1, %c0_i32, %arg0 : i32, i32, i32
  }
  func.func @transform_1(%arg0: i32, %arg1: i32) -> (i32, i32, i32) {
    %c0_i32 = arith.constant 0 : i32
    %c0_i32_0 = arith.constant 0 : i32
    return %arg1, %c0_i32, %arg0 : i32, i32, i32
  }
  func.func @transform_2(%arg0: i32, %arg1: i32) -> (i32, i32) {
    %c0_i32 = arith.constant 0 : i32
    %c0_i32_0 = arith.constant 0 : i32
    return %c0_i32, %arg0 : i32, i32
  }
  func.func @transform_3(%arg0: i32, %arg1: i32) -> (i32, i32, i32) {
    %c0_i32 = arith.constant 0 : i32
    %c0_i32_0 = arith.constant 0 : i32
    return %arg1, %c0_i32, %arg0 : i32, i32, i32
  }
}

</mosaic_0001>

<bundles_post_ra>
// kernel: tpu_custom_call.1
= control target key start
LH: loop header
LB: loop body
LE: loop exit
PB: predicated region body
PF: predicated region fallthrough
CT: control target
= control target key end

     0   :  { %8 = vsyncpa [#allocation4], 0  ;;  %s347_s0 = inlined_call_operand.hbm [shape: f32[8,8,128], index: 0, kind: input, shape index: {}]   ;;  %s348_s1 = inlined_call_operand.hbm [shape: f32[8,8,128], index: 1, kind: input, shape index: {}]   ;;  %s349_s2 = inlined_call_operand.hbm [shape: f32[8,128], index: 2, kind: input, shape index: {}]   ;;  %s350_s3 = inlined_call_operand.hbm [shape: f32[8,8,128], index: 3, kind: output, shape index: {}]  }
   0x1   :  { %9 = vsyncpa [#allocation7], 0 }
   0x2   :  { %10 = vsyncpa [#allocation5], 0  ;;  %s257_s12 = smov [#allocation6]   ;;  %s258_s14 = smov [#allocation3]  }
   0x3   :  { %s28_s13 = sshll.u32 %s257_s12, 4  ;;  %s16_s15 = sshll.u32 %s258_s14, 4  ;;  %s29_s13 = int_to_ptr.vmem [resolvable:$true] %s28_s13  ;;  %s283_s15 = int_to_ptr.vmem [resolvable:$true] %s16_s15 }
   0x4   :  { %s163_s18 = scalar_lea.hbm %s348_s1, 1024 }
   0x5   :  { %p164_p0 = scmp.ne.s32.totalorder %s348_s1, %s163_s18  ;;  %p167_p1 = scmp.lt.u32.totalorder %s163_s18, %s348_s1 }
   0x7   :  { %p169_p2 = pnand %p167_p1, %p164_p0 }
   0x9   :  { %172 = shalt.err (!%p169_p2)
}
   0xa   :  { %s173_s23 = scalar_lea.vmem %s29_s13, 1024  ;;  %p178_p4 = scmp.lt.s32.totalorder %s29_s13, %s29_s13 }
   0xb   :  { %p174_p3 = scmp.ne.s32.totalorder %s29_s13, %s173_s23  ;;  %p179_p5 = scmp.lt.s32.totalorder %s173_s23, %s173_s23 }
   0xd   :  { %p180_p6 = por %p179_p5, %p178_p4 }
   0xf   :  { %p181_p7 = pnand %p180_p6, %p174_p3 }
  0x11   :  { %184 = shalt.err (!%p181_p7)
}
  0x12   :  { %s259_s24 = smov 128   ;;  %s260_s25 = smov 8  }
  0x13   :  { %34 = dma.hbm_to_vmem [thread:$0]  %s348_s1, 1024, %s29_s13, [#allocation7], %s259_s24, %s259_s24, %s260_s25  }
  0x14   :  { %s185_s30 = scalar_lea.hbm %s347_s0, 1024 }
  0x15   :  { %p186_p8 = scmp.ne.s32.totalorder %s347_s0, %s185_s30  ;;  %p189_p9 = scmp.lt.u32.totalorder %s185_s30, %s347_s0 }
  0x17   :  { %p191_p10 = pnand %p189_p9, %p186_p8 }
  0x19   :  { %194 = shalt.err (!%p191_p10)
}
  0x1a   :  { %s195_s8 = scalar_lea.vmem %s283_s15, 1024  ;;  %p200_p12 = scmp.lt.s32.totalorder %s283_s15, %s283_s15 }
  0x1b   :  { %p196_p11 = scmp.ne.s32.totalorder %s283_s15, %s195_s8  ;;  %p201_p13 = scmp.lt.s32.totalorder %s195_s8, %s195_s8 }
  0x1d   :  { %p202_p0 = por %p201_p13, %p200_p12 }
  0x1f   :  { %p203_p1 = pnand %p202_p0, %p196_p11 }
  0x21   :  { %206 = shalt.err (!%p203_p1)
}
  0x22   :  { %22 = dma.hbm_to_vmem [thread:$0]  %s347_s0, 1024, %s283_s15, [#allocation4], %s259_s24, %s259_s24, %s260_s25  }
  0x23   :  { %s261_s10 = smov [#allocation8]   ;;  %s207_s14 = scalar_lea.hbm %s349_s2, 128 }
  0x24   :  { %s41_s11 = sshll.u32 %s261_s10, 4  ;;  %p208_p2 = scmp.ne.s32.totalorder %s349_s2, %s207_s14  ;;  %s42_s11 = int_to_ptr.vmem [resolvable:$true] %s41_s11 }
  0x25   :  { %p211_p3 = scmp.lt.u32.totalorder %s207_s14, %s349_s2 }
  0x27   :  { %p213_p4 = pnand %p211_p3, %p208_p2 }
  0x29   :  { %216 = shalt.err (!%p213_p4)
}
  0x2a   :  { %s217_s20 = scalar_lea.vmem %s42_s11, 128  ;;  %p222_p6 = scmp.lt.s32.totalorder %s42_s11, %s42_s11 }
  0x2b   :  { %p218_p5 = scmp.ne.s32.totalorder %s42_s11, %s217_s20  ;;  %p223_p7 = scmp.lt.s32.totalorder %s217_s20, %s217_s20 }
  0x2d   :  { %p224_p8 = por %p223_p7, %p222_p6 }
  0x2f   :  { %p225_p9 = pnand %p224_p8, %p218_p5 }
  0x31   :  { %228 = shalt.err (!%p225_p9)
}
  0x32   :  { %44 = dma.hbm_to_vmem [thread:$0]  %s349_s2, 128, %s42_s11, [#allocation7]  }
  0x33   :  { %251 = dma.done.wait [#allocation4], 1024  }
  0x34   :  { %252 = vsyncadd [#allocation4], 4294966272 }
  0x35   :  { %253 = dma.done.wait [#allocation7], 1152  }
  0x36   :  { %254 = vsyncadd [#allocation7], 4294966144  ;;  %v58_v0 = vld [vmem:[#allocation8] sm:$0xff]  ;;  %v69_v5 = vld [vmem:[#allocation3 + $0x8] sm:$0xff]  ;;  %s262_s2 = smov [#allocation9]  }
  0x37   :  { %v61_v1 = vld [vmem:[#allocation3] sm:$0xff]  ;;  %v71_v6 = vld [vmem:[#allocation6 + $0x8] sm:$0xff]  ;;  %v73_v8 = vsub.f32 1.0, %v69_v5  ;;  %v79_v9 = vld [vmem:[#allocation3 + $0x10] sm:$0xff]  ;;  %s144_s21 = sshll.u32 %s262_s2, 4  ;;  %s145_s21 = int_to_ptr.vmem [resolvable:$true] %s144_s21 }
  0x38   :  { %v62_v2 = vld [vmem:[#allocation6] sm:$0xff]  ;;  %v64_v4 = vsub.f32 1.0, %v61_v1  ;;  %v72_v11 = vmul.f32 %v71_v6, %v69_v5  ;;  %v81_v12 = vld [vmem:[#allocation6 + $0x10] sm:$0xff]  ;;  %v83_v14 = vsub.f32 1.0, %v79_v9  ;;  %v89_v15 = vld [vmem:[#allocation3 + $0x18] sm:$0xff]  ;;  %s229_s22 = scalar_lea.vmem %s145_s21, 1024  ;;  %p234_p11 = scmp.lt.s32.totalorder %s145_s21, %s145_s21 }
  0x39   :  { %v63_v3 = vmul.f32 %v62_v2, %v61_v1  ;;  %v82_v17 = vmul.f32 %v81_v12, %v79_v9  ;;  %v91_v18 = vld [vmem:[#allocation6 + $0x18] sm:$0xff]  ;;  %v93_v20 = vsub.f32 1.0, %v89_v15  ;;  %v99_v21 = vld [vmem:[#allocation3 + $0x20] sm:$0xff]  ;;  %v109_v27 = vld [vmem:[#allocation3 + $0x28] sm:$0xff]  ;;  %p230_p10 = scmp.ne.s32.totalorder %s145_s21, %s229_s22  ;;  %p235_p12 = scmp.lt.s32.totalorder %s229_s22, %s229_s22 }
  0x3a   :  { %v65_v7 = vmul.f32 %v64_v4, %v58_v0  ;;  %v92_v23 = vmul.f32 %v91_v18, %v89_v15  ;;  %v101_v24 = vld [vmem:[#allocation6 + $0x20] sm:$0xff]  ;;  %v103_v26 = vsub.f32 1.0, %v99_v21  ;;  %v111_v30 = vld [vmem:[#allocation6 + $0x28] sm:$0xff]  ;;  %v113_v32 = vsub.f32 1.0, %v109_v27  ;;  %v119_v33 = vld [vmem:[#allocation3 + $0x30] sm:$0xff] }
  0x3b   :  { %v102_v29 = vmul.f32 %v101_v24, %v99_v21  ;;  %v112_v35 = vmul.f32 %v111_v30, %v109_v27  ;;  %v121_v36 = vld [vmem:[#allocation6 + $0x30] sm:$0xff]  ;;  %v123_v38 = vsub.f32 1.0, %v119_v33  ;;  %v129_v39 = vld [vmem:[#allocation3 + $0x38] sm:$0xff]  ;;  %p236_p13 = por %p235_p12, %p234_p11 }
  0x3c   :  { %v66_v10 = vadd.f32 %v65_v7, %v63_v3  ;;  %v122_v41 = vmul.f32 %v121_v36, %v119_v33  ;;  %v131_v42 = vld [vmem:[#allocation6 + $0x38] sm:$0xff]  ;;  %v133_v44 = vsub.f32 1.0, %v129_v39 }
  0x3d   :  { %v132_v46 = vmul.f32 %v131_v42, %v129_v39  ;;  %p237_p0 = pnand %p236_p13, %p230_p10 }
  0x3e   :  { %67 = vst [vmem:[#allocation9] sm:$0xff] %v66_v10  ;;  %v74_v13 = vmul.f32 %v73_v8, %v66_v10 }
  0x40   :  { %v75_v16 = vadd.f32 %v74_v13, %v72_v11 }
  0x42   :  { %77 = vst [vmem:[#allocation9 + $0x8] sm:$0xff] %v75_v16  ;;  %v84_v19 = vmul.f32 %v83_v14, %v75_v16 }
  0x44   :  { %v85_v22 = vadd.f32 %v84_v19, %v82_v17 }
  0x46   :  { %87 = vst [vmem:[#allocation9 + $0x10] sm:$0xff] %v85_v22  ;;  %v94_v25 = vmul.f32 %v93_v20, %v85_v22 }
  0x48   :  { %v95_v28 = vadd.f32 %v94_v25, %v92_v23 }
  0x4a   :  { %97 = vst [vmem:[#allocation9 + $0x18] sm:$0xff] %v95_v28  ;;  %v104_v31 = vmul.f32 %v103_v26, %v95_v28 }
  0x4c   :  { %v105_v34 = vadd.f32 %v104_v31, %v102_v29 }
  0x4e   :  { %107 = vst [vmem:[#allocation9 + $0x20] sm:$0xff] %v105_v34  ;;  %v114_v37 = vmul.f32 %v113_v32, %v105_v34 }
  0x50   :  { %v115_v40 = vadd.f32 %v114_v37, %v112_v35 }
  0x52   :  { %117 = vst [vmem:[#allocation9 + $0x28] sm:$0xff] %v115_v40  ;;  %v124_v43 = vmul.f32 %v123_v38, %v115_v40 }
  0x54   :  { %v125_v45 = vadd.f32 %v124_v43, %v122_v41 }
  0x56   :  { %127 = vst [vmem:[#allocation9 + $0x30] sm:$0xff] %v125_v45  ;;  %v134_v47 = vmul.f32 %v133_v44, %v125_v45 }
  0x58   :  { %v135_v48 = vadd.f32 %v134_v47, %v132_v46 }
  0x5a   :  { %137 = vst [vmem:[#allocation9 + $0x38] sm:$0xff] %v135_v48 }
  0x5b   :  { %240 = shalt.err (!%p237_p0)
}
  0x5c   :  { %s241_s27 = scalar_lea.hbm %s350_s3, 1024 }
  0x5d   :  { %p242_p1 = scmp.ne.s32.totalorder %s350_s3, %s241_s27  ;;  %p245_p2 = scmp.lt.u32.totalorder %s241_s27, %s350_s3 }
  0x5f   :  { %p247_p3 = pnand %p245_p2, %p242_p1 }
  0x61   :  { %250 = shalt.err (!%p247_p3)
}
  0x62   :  { %150 = dma.vmem_to_hbm [thread:$0]  %s145_s21, 1024, %s350_s3, [#allocation5], %s259_s24, %s259_s24, %s260_s25  }
  0x63   :  { %255 = dma.done.wait [#allocation5], 1024  }
  0x64   :  { %256 = vsyncadd [#allocation5], 4294966272 }
  0x65   :  { %154 = vsyncpa [#allocation4], 1 }
  0x66   :  { %155 = vsyncpa [#allocation7], 1 }
  0x67   :  { %156 = vsyncpa [#allocation5], 1 }

</bundles_post_ra>
